<compile_context>
chip_gen: v6e
topology: v6e:2x2x1
jax: 0.10.0
libtpu: 0.0.40
codegen_flags: <defaults>
</compile_context>

<pallas_src>
import jax
import jax.numpy as jnp
from jax.experimental import pallas as pl
from jax.experimental.pallas import tpu as pltpu

_LANDMARKS = 68
_ROW = _LANDMARKS * 2  # 136 values per landmark vector


def _make_dma_copy_kernel(chunk_bounds):
    """Build a kernel that copies HBM->HBM in a few large overlapping DMAs.

    chunk_bounds: tuple of static (row_start, row_count) pairs partitioning
    the leading axis of the (rows, 136) slab.  Each chunk is a fully
    contiguous region in HBM, so every DMA is a flat bulk copy.
    """

    def kernel(x_hbm, o_hbm, sems):
        copies = []
        # Start every chunk DMA first ...
        for idx, (start, size) in enumerate(chunk_bounds):
            cp = pltpu.make_async_copy(
                x_hbm.at[pl.ds(start, size), :],
                o_hbm.at[pl.ds(start, size), :],
                sems.at[idx],
            )
            cp.start()
            copies.append(cp)
        # ... then wait on all of them, so the DMA engines overlap.
        for cp in copies:
            cp.wait()

    return kernel


def coords_forward(x):
    """Equivalent of Coords()(x) == x.view(-1, 68, 2)."""
    total = x.size
    assert total % _ROW == 0, "input must have a multiple of 136 elements"
    n = total // _ROW

    # Metadata-only flatten to (n, 136); this is the shape the DMA sees.
    x2 = x.reshape(n, _ROW)

    itemsize = jnp.dtype(x.dtype).itemsize
    total_bytes = total * itemsize

    # 1 chunk for tiny inputs; up to 4 large chunks for bigger ones so
    # multiple DMA engines / both v7x TCs' DMA paths can run concurrently.
    n_chunks = 1 if total_bytes <= (1 << 20) else 4
    n_chunks = min(n_chunks, n)

    # Static, contiguous row partition of the slab (shapes are static under
    # JAX tracing, so this is resolved at trace time).
    base, rem = divmod(n, n_chunks)
    bounds = []
    start = 0
    for c in range(n_chunks):
        size = base + (1 if c < rem else 0)
        bounds.append((start, size))
        start += size

    out_flat = pl.pallas_call(
        _make_dma_copy_kernel(tuple(bounds)),
        out_shape=jax.ShapeDtypeStruct((n, _ROW), x.dtype),
        in_specs=[pl.BlockSpec(memory_space=pl.ANY)],
        out_specs=pl.BlockSpec(memory_space=pl.ANY),
        scratch_shapes=[pltpu.SemaphoreType.DMA((n_chunks,))],
        compiler_params=pltpu.CompilerParams(has_side_effects=True),
    )(x2)

    # Metadata-only reshape to the module's output shape.
    return out_flat.reshape(n, _LANDMARKS, 2)


if __name__ == "__main__":
    key = jax.random.PRNGKey(0)
    k1, k2, k3 = jax.random.split(key, 3)

    # Case 1: small batch of landmark vectors (single-chunk DMA path).
    x_small = jax.random.normal(k1, (2, 136), dtype=jnp.float32)
    y_small = coords_forward(x_small)
    jax.block_until_ready(y_small)
    assert y_small.shape == (2, 68, 2)
    assert jnp.array_equal(y_small, x_small.reshape(-1, 68, 2))

    # Case 2: larger batch, already 3-D shaped input.
    x_mid = jax.random.normal(k2, (16, 68, 2), dtype=jnp.float32)
    y_mid = coords_forward(x_mid)
    jax.block_until_ready(y_mid)
    assert y_mid.shape == (16, 68, 2)
    assert jnp.array_equal(y_mid, x_mid.reshape(-1, 68, 2))

    # Case 3: bf16 input — the DMA path has no sublane-packing hazards.
    x_bf16 = jax.random.normal(k3, (8, 136), dtype=jnp.bfloat16)
    y_bf16 = coords_forward(x_bf16)
    jax.block_until_ready(y_bf16)
    assert y_bf16.shape == (8, 68, 2)
    assert jnp.array_equal(y_bf16, x_bf16.reshape(-1, 68, 2))

    print("KERNEL_OK")
</pallas_src>

<mosaic_0001>
module attributes {stable_mosaic.version = 11 : i64} {
  func.func @kernel(%arg0: memref<2x136xf32, #tpu.memory_space<any>>, %arg1: memref<2x136xf32, #tpu.memory_space<any>>, %arg2: memref<1x!tpu.dma_semaphore, #tpu.memory_space<semaphore_mem>>) attributes {dimension_semantics = [], scalar_prefetch = 0 : i64, scratch_operands = 1 : i64, tpu.core_type = #tpu.core_type<tc>} {
    %c0_i32 = arith.constant 0 : i32
    %c0_i32_0 = arith.constant 0 : i32
    %c0_i32_1 = arith.constant 0 : i32
    %0 = tpu.memref_slice %arg0[%c0_i32_0, %c0_i32_1] : memref<2x136xf32, #tpu.memory_space<any>> -> memref<2x136xf32, #tpu.memory_space<any>>
    %c0_i32_2 = arith.constant 0 : i32
    %c0_i32_3 = arith.constant 0 : i32
    %1 = tpu.memref_slice %arg1[%c0_i32_2, %c0_i32_3] : memref<2x136xf32, #tpu.memory_space<any>> -> memref<2x136xf32, #tpu.memory_space<any>>
    %2 = tpu.memref_slice %arg2[%c0_i32] : memref<1x!tpu.dma_semaphore, #tpu.memory_space<semaphore_mem>> -> memref<1x!tpu.dma_semaphore, #tpu.memory_space<semaphore_mem>>
    %3 = tpu.memref_squeeze %2 : memref<1x!tpu.dma_semaphore, #tpu.memory_space<semaphore_mem>> -> memref<!tpu.dma_semaphore, #tpu.memory_space<semaphore_mem>>
    tpu.enqueue_dma source(%0 : memref<2x136xf32, #tpu.memory_space<any>>) target(%1 : memref<2x136xf32, #tpu.memory_space<any>>) target_semaphore(%3 : memref<!tpu.dma_semaphore, #tpu.memory_space<semaphore_mem>>)
    %c0_i32_4 = arith.constant 0 : i32
    %c0_i32_5 = arith.constant 0 : i32
    %c0_i32_6 = arith.constant 0 : i32
    %4 = tpu.memref_slice %arg0[%c0_i32_5, %c0_i32_6] : memref<2x136xf32, #tpu.memory_space<any>> -> memref<2x136xf32, #tpu.memory_space<any>>
    %c0_i32_7 = arith.constant 0 : i32
    %c0_i32_8 = arith.constant 0 : i32
    %5 = tpu.memref_slice %arg1[%c0_i32_7, %c0_i32_8] : memref<2x136xf32, #tpu.memory_space<any>> -> memref<2x136xf32, #tpu.memory_space<any>>
    %6 = tpu.memref_slice %arg2[%c0_i32_4] : memref<1x!tpu.dma_semaphore, #tpu.memory_space<semaphore_mem>> -> memref<1x!tpu.dma_semaphore, #tpu.memory_space<semaphore_mem>>
    %7 = tpu.memref_squeeze %6 : memref<1x!tpu.dma_semaphore, #tpu.memory_space<semaphore_mem>> -> memref<!tpu.dma_semaphore, #tpu.memory_space<semaphore_mem>>
    tpu.wait_dma2 semaphore(%7 : memref<!tpu.dma_semaphore, #tpu.memory_space<semaphore_mem>>) src(%4 : memref<2x136xf32, #tpu.memory_space<any>>) dst(%5 : memref<2x136xf32, #tpu.memory_space<any>>)
    return
  }
}

</mosaic_0001>

<bundles_post_ra>
// kernel: tpu_custom_call.1
= control target key start
LH: loop header
LB: loop body
LE: loop exit
PB: predicated region body
PF: predicated region fallthrough
CT: control target
= control target key end

     0   :  { %s29_s6 = smov [#allocation2]   ;;  %s30_s7 = smov 131072   ;;  %s48_s0 = inlined_call_operand.hbm [shape: f32[2,136], index: 0, kind: input, shape index: {}]   ;;  %s49_s1 = inlined_call_operand.hbm [shape: f32[2,136], index: 1, kind: output, shape index: {}]  }
   0x1   :  { %s31_s8 = smov 0  }
   0x2   :  { %12 = dma.general %s48_s0, 64, %s49_s1, %s29_s6, %s30_s7, [#allocation4], %s31_s8, 0  }
   0x3   :  { %27 = dma.done.wait [#allocation2], 64 }
   0x4   :  { %28 = vsyncadd [#allocation2], 4294967232 }
   0x5   :  { %17 = vsyncmov [#allocation2] }
   0x8   :  { %s18_s13 = vpop.sfrf %17 }
   0x9   :  { %p23_p0 = scmp.ne.s32.totalorder %s18_s13, 0 }
   0xb   :  { %22 = shalt.err (%p23_p0)  }

</bundles_post_ra>
